<compile_context>
chip_gen: v7x
topology: tpu7x:2x2x1
jax: 0.10.0
libtpu: 0.0.40
codegen_flags: <defaults>
</compile_context>

<pallas_src>
import functools
import math

import jax
import jax.numpy as jnp
from jax.experimental import pallas as pl
from jax.experimental.pallas import tpu as pltpu


# ----------------------------------------------------------------------------
# Core Pallas kernel: tiled (M, Kd) @ (Kd, Cout) + bias on the MXU.
# ----------------------------------------------------------------------------

_LANE = 128    # TPU lane width: pad Kd / Cout to this for lane-dense operands/stores.
_TM = 256      # M tile: multiple of 256 (v6e MXU) and 128 (v5e). Double-buffered
               # footprint ~1 MiB << the 16/32 MiB scoped-VMEM defaults on all gens,
               # so no vmem_limit_bytes override is needed.


def _round_up(x: int, m: int) -> int:
    return (x + m - 1) // m * m


def _matmul_bias_kernel(x_ref, w_ref, b_ref, o_ref):
    # (TM, KdP) bf16 @ (KdP, CoP) bf16 -> f32 MXU accumulation, f32 bias add,
    # lane-dense (CoP is a multiple of 128) unmasked stores.
    acc = jnp.dot(x_ref[...], w_ref[...], preferred_element_type=jnp.float32)
    o_ref[...] = acc + b_ref[...]


def _tiled_matmul_bias(xp, wf, bias):
    """xp: [M, Kd] f32, wf: [Kd, Cout] f32, bias: [Cout] f32 -> [M, Cout] f32."""
    M, Kd = xp.shape
    Cout = wf.shape[1]

    KdP = _round_up(Kd, _LANE)      # lane-dense contraction axis
    CoP = _round_up(Cout, _LANE)    # lane-dense output axis (no masked stores)
    MP = _round_up(M, _TM)          # pad M so the tail tile never goes OOB

    # bf16 MXU operands; accumulation stays f32 inside the kernel.
    xp_p = jnp.pad(xp.astype(jnp.bfloat16), ((0, MP - M), (0, KdP - Kd)))
    wf_p = jnp.pad(wf.astype(jnp.bfloat16), ((0, KdP - Kd), (0, CoP - Cout)))
    b_p = jnp.pad(bias.astype(jnp.float32), (0, CoP - Cout)).reshape(1, CoP)

    cost = pl.CostEstimate(
        flops=2 * MP * KdP * CoP,
        transcendentals=0,
        bytes_accessed=xp_p.size * 2 + wf_p.size * 2 + b_p.size * 4 + MP * CoP * 4,
    )

    out = pl.pallas_call(
        _matmul_bias_kernel,
        out_shape=jax.ShapeDtypeStruct((MP, CoP), jnp.float32),
        grid=(MP // _TM,),
        in_specs=[
            pl.BlockSpec((_TM, KdP), lambda i: (i, 0)),   # streamed M tiles (pipelined)
            pl.BlockSpec((KdP, CoP), lambda i: (0, 0)),   # weight: VMEM-resident
            pl.BlockSpec((1, CoP), lambda i: (0, 0)),     # bias:   VMEM-resident
        ],
        out_specs=pl.BlockSpec((_TM, CoP), lambda i: (i, 0)),
        compiler_params=pltpu.CompilerParams(
            dimension_semantics=("parallel",),            # megacore sharding on v7x
        ),
        cost_estimate=cost,
    )(xp_p, wf_p, b_p)

    # NOTE: if Kd ever grows large (big Cin*K*K), add a trailing "arbitrary" K grid
    # axis with an f32 VMEM accumulator (pl.when init/finalize) instead of widening
    # the (TM, Kd) strip — not needed for FNO widths (<= 128 after padding).
    return out[:M, :Cout]


# ----------------------------------------------------------------------------
# Full-stride conv (Conv2d kernel=stride=K, padding=0), channels-last.
# K == 1 is exactly the pointwise (1x1) conv used by FNO lifting / skip / projection.
# ----------------------------------------------------------------------------

def full_stride_conv2d_nhwc(x, weight, bias, K):
    """x: [B, H, W, Cin] f32, weight: [Cout, Cin, K, K] (PyTorch OIHW), bias: [Cout]."""
    B, H, W, Cin = x.shape
    Cout = weight.shape[0]
    assert H % K == 0 and W % K == 0
    Ho, Wo = H // K, W // K
    if K == 1:
        xp = x.reshape(B * H * W, Cin)            # pure reshape: no HBM transpose pass
    else:
        xp = (x.reshape(B, Ho, K, Wo, K, Cin)
                .transpose(0, 1, 3, 2, 4, 5)
                .reshape(B * Ho * Wo, K * K * Cin))
    wf = weight.transpose(2, 3, 1, 0).reshape(K * K * Cin, Cout)   # (kh, kw, ci) -> co
    out = _tiled_matmul_bias(xp, wf, bias)        # Pallas MXU kernel
    return out.reshape(B, Ho, Wo, Cout)           # stays channels-last (no NCHW transpose)


def full_stride_conv2d_nhwc_ref(x, weight, bias, K):
    """Pure-XLA reference with the same bf16-operand / f32-accumulate numerics."""
    B, H, W, Cin = x.shape
    Cout = weight.shape[0]
    Ho, Wo = H // K, W // K
    xp = (x.reshape(B, Ho, K, Wo, K, Cin).transpose(0, 1, 3, 2, 4, 5)
            .reshape(B * Ho * Wo, K * K * Cin))
    wf = weight.transpose(2, 3, 1, 0).reshape(K * K * Cin, Cout)
    out = jnp.dot(xp.astype(jnp.bfloat16), wf.astype(jnp.bfloat16),
                  preferred_element_type=jnp.float32) + bias[None, :]
    return out.reshape(B, Ho, Wo, Cout)


# ----------------------------------------------------------------------------
# Spectral convolution (truncated Fourier modes), channels-last.
# ----------------------------------------------------------------------------

def spectral_conv2d(x, w1, w2, modes):
    """x: [B, H, W, C] f32; w1, w2: complex64 [Cin, Cout, modes, modes]."""
    B, H, W, C = x.shape
    m = modes
    # TODO(synk): no Pallas FFT primitive — rfft2/irfft2 and the tiny per-mode complex
    # channel mixing stay in XLA.
    x_ft = jnp.fft.rfft2(x, axes=(1, 2))                       # [B, H, W//2+1, C]
    lo = jnp.einsum("bxyi,ioxy->bxyo", x_ft[:, :m, :m, :], w1)
    hi = jnp.einsum("bxyi,ioxy->bxyo", x_ft[:, -m:, :m, :], w2)
    out_ft = jnp.zeros_like(x_ft)
    out_ft = out_ft.at[:, :m, :m, :].set(lo)
    out_ft = out_ft.at[:, -m:, :m, :].set(hi)
    return jnp.fft.irfft2(out_ft, s=(H, W), axes=(1, 2))


# ----------------------------------------------------------------------------
# FNO2DModel forward.
# ----------------------------------------------------------------------------

def fno2d_forward(x_flat, params, *, n, modes, conv_fn):
    B = x_flat.shape[0]
    x = x_flat.reshape(B, n, n, 1)                 # flat_to_multi + unsqueeze(1), NHWC
    x = conv_fn(x, params["lift_w"], params["lift_b"], 1)        # lifting 1 -> width
    n_layers = len(params["layers"])
    for li, layer in enumerate(params["layers"]):
        x_spec = spectral_conv2d(x, layer["w1"], layer["w2"], modes)
        x_skip = conv_fn(x, layer["skip_w"], layer["skip_b"], 1)
        x = x_spec + x_skip
        if li < n_layers - 1:
            x = jax.nn.gelu(x, approximate=False)
    x = jax.nn.gelu(conv_fn(x, params["p1_w"], params["p1_b"], 1), approximate=False)
    x = conv_fn(x, params["p2_w"], params["p2_b"], 1)            # proj_hidden -> 1
    return x.reshape(B, n * n)                     # squeeze(1) + multi_to_flat


def init_params(key, *, in_ch, width, depth, modes, proj_hidden, out_ch):
    keys = iter(jax.random.split(key, 2 + 4 * depth + 4))

    def conv1x1(cin, cout):
        bound = 1.0 / math.sqrt(cin)
        w = jax.random.uniform(next(keys), (cout, cin, 1, 1), jnp.float32, -bound, bound)
        b = jax.random.uniform(next(keys), (cout,), jnp.float32, -bound, bound)
        return w, b

    def spectral_weight():
        scale = 1.0 / (width * width)
        r = jax.random.uniform(next(keys), (2, width, width, modes, modes), jnp.float32)
        return (scale * (r[0] + 1j * r[1])).astype(jnp.complex64)

    lift_w, lift_b = conv1x1(in_ch, width)
    layers = []
    for _ in range(depth):
        w1 = spectral_weight()
        w2 = spectral_weight()
        skip_w, skip_b = conv1x1(width, width)
        layers.append({"w1": w1, "w2": w2, "skip_w": skip_w, "skip_b": skip_b})
    p1_w, p1_b = conv1x1(width, proj_hidden)
    p2_w, p2_b = conv1x1(proj_hidden, out_ch)
    return {"lift_w": lift_w, "lift_b": lift_b, "layers": layers,
            "p1_w": p1_w, "p1_b": p1_b, "p2_w": p2_w, "p2_b": p2_b}


if __name__ == "__main__":
    key = jax.random.PRNGKey(0)
    k_x, k_p, k_cx, k_cw, k_cb = jax.random.split(key, 5)

    # FNO2DModel hyper-params: fno_params = (nr_fourier_modes, width, depth)
    MODES, WIDTH, DEPTH = 4, 32, 2
    N = 16                 # nr_spacediscr  -> input_values: [B, N*N]
    B = 2
    PROJ_HIDDEN = 64

    params = init_params(k_p, in_ch=1, width=WIDTH, depth=DEPTH, modes=MODES,
                         proj_hidden=PROJ_HIDDEN, out_ch=1)
    x_flat = jax.random.normal(k_x, (B, N * N), jnp.float32)

    fwd_pallas = jax.jit(functools.partial(
        fno2d_forward, n=N, modes=MODES, conv_fn=full_stride_conv2d_nhwc))
    fwd_ref = jax.jit(functools.partial(
        fno2d_forward, n=N, modes=MODES, conv_fn=full_stride_conv2d_nhwc_ref))

    out = jax.block_until_ready(fwd_pallas(x_flat, params))
    ref = jax.block_until_ready(fwd_ref(x_flat, params))
    assert out.shape == (B, N * N)
    assert jnp.allclose(out, ref, atol=2e-3, rtol=2e-3), (
        float(jnp.max(jnp.abs(out - ref))))

    # Sanity-check the general K > 1 full-stride-conv path (incl. M < TM tail padding)
    # against XLA's native strided convolution with matching bf16/f32 numerics.
    xc = jax.random.normal(k_cx, (2, 8, 8, 3), jnp.float32)
    wc = 0.2 * jax.random.normal(k_cw, (5, 3, 2, 2), jnp.float32)
    bc = 0.1 * jax.random.normal(k_cb, (5,), jnp.float32)
    outc = jax.block_until_ready(full_stride_conv2d_nhwc(xc, wc, bc, 2))
    refc = jax.lax.conv_general_dilated(
        xc.astype(jnp.bfloat16), wc.astype(jnp.bfloat16),
        window_strides=(2, 2), padding="VALID",
        dimension_numbers=("NHWC", "OIHW", "NHWC"),
        preferred_element_type=jnp.float32) + bc.reshape(1, 1, 1, 5)
    assert outc.shape == (2, 4, 4, 5)
    assert jnp.allclose(outc, refc, atol=2e-3, rtol=2e-3), (
        float(jnp.max(jnp.abs(outc - refc))))

    print("KERNEL_OK")
</pallas_src>

<mosaic_0001>
module attributes {stable_mosaic.version = 11 : i64} {
  func.func @_matmul_bias_kernel(%arg0: i32, %arg1: memref<256x128xbf16, #tpu.memory_space<vmem>>, %arg2: memref<128x128xbf16, #tpu.memory_space<vmem>>, %arg3: memref<1x128xf32, #tpu.memory_space<vmem>>, %arg4: memref<256x128xf32, #tpu.memory_space<vmem>>) attributes {dimension_semantics = [#tpu.dimension_semantics<parallel>], iteration_bounds = array<i64: 2>, scalar_prefetch = 0 : i64, scratch_operands = 0 : i64, tpu.core_type = #tpu.core_type<tc>, window_params = [{transform_indices = @transform_0, window_bounds = array<i64: 256, 128>}, {pipeline_mode = #tpu.pipeline_mode<synchronous>, transform_indices = @transform_1, window_bounds = array<i64: 128, 128>}, {pipeline_mode = #tpu.pipeline_mode<synchronous>, transform_indices = @transform_2, window_bounds = array<i64: 1, 128>}, {transform_indices = @transform_3, window_bounds = array<i64: 256, 128>}]} {
    %c0 = arith.constant 0 : index
    %c0_0 = arith.constant 0 : index
    %0 = vector.load %arg1[%c0, %c0_0] : memref<256x128xbf16, #tpu.memory_space<vmem>>, vector<256x128xbf16>
    %c0_1 = arith.constant 0 : index
    %c0_2 = arith.constant 0 : index
    %1 = vector.load %arg2[%c0_1, %c0_2] : memref<128x128xbf16, #tpu.memory_space<vmem>>, vector<128x128xbf16>
    %cst = arith.constant dense<0.000000e+00> : vector<256x128xf32>
    %2 = tpu.matmul %0, %1, %cst {dimension_numbers = #tpu.dot_dimension_numbers<[1], [0], [0], [1], [0, 0, 1, 1], [], []>} : vector<256x128xbf16>, vector<128x128xbf16>, vector<256x128xf32> -> vector<256x128xf32>
    %c0_3 = arith.constant 0 : index
    %c0_4 = arith.constant 0 : index
    %3 = vector.load %arg3[%c0_3, %c0_4] : memref<1x128xf32, #tpu.memory_space<vmem>>, vector<1x128xf32>
    %4 = vector.broadcast %3 : vector<1x128xf32> to vector<256x128xf32>
    %5 = arith.addf %2, %4 : vector<256x128xf32>
    %c0_5 = arith.constant 0 : index
    %c0_6 = arith.constant 0 : index
    %6 = vector.load %arg4[%c0_5, %c0_6] : memref<256x128xf32, #tpu.memory_space<vmem>>, vector<256x128xf32>
    tpu.vector_store %arg4[%c0_5, %c0_6], %5 {strides = array<i32>} : memref<256x128xf32, #tpu.memory_space<vmem>>, vector<256x128xf32>,
    return
  }
  func.func @transform_0(%arg0: i32) -> (i32, i32) {
    %c0_i32 = arith.constant 0 : i32
    %c0_i32_0 = arith.constant 0 : i32
    return %arg0, %c0_i32 : i32, i32
  }
  func.func @transform_1(%arg0: i32) -> (i32, i32) {
    %c0_i32 = arith.constant 0 : i32
    %c0_i32_0 = arith.constant 0 : i32
    %c0_i32_1 = arith.constant 0 : i32
    return %c0_i32, %c0_i32_0 : i32, i32
  }
  func.func @transform_2(%arg0: i32) -> (i32, i32) {
    %c0_i32 = arith.constant 0 : i32
    %c0_i32_0 = arith.constant 0 : i32
    %c0_i32_1 = arith.constant 0 : i32
    return %c0_i32, %c0_i32_0 : i32, i32
  }
  func.func @transform_3(%arg0: i32) -> (i32, i32) {
    %c0_i32 = arith.constant 0 : i32
    %c0_i32_0 = arith.constant 0 : i32
    return %arg0, %c0_i32 : i32, i32
  }
}

</mosaic_0001>

<bundles_post_ra>
// kernel: fno2d_forward.5
= control target key start
LH: loop header
LB: loop body
LE: loop exit
PB: predicated region body
PF: predicated region fallthrough
CT: control target
= control target key end

     0   :  { %s807_s12 = smov 0   ;;  %s941_s0 = inlined_call_operand.vmem [shape: bf16[512,128], index: 0, kind: input, shape index: {}]   ;;  %s942_s1 = inlined_call_operand.vmem [shape: bf16[128,128], index: 1, kind: input, shape index: {}]   ;;  %s943_s2 = inlined_call_operand.vmem [shape: f32[1,128], index: 2, kind: input, shape index: {}]   ;;  %s944_s3 = inlined_call_operand.vmem [shape: f32[512,128], index: 3, kind: output, shape index: {}]  }
   0x1 LB: > { %s623_s13 = sadd.s32 4294967295, %s785_s12   ;;  %p627_p0 = scmp.ge.s32.totalorder %s785_s12, 1  ;;  %s785_s12 = sphi %s807_s12, %s13_s12  }
   0x2   : > { %p138_p1 = scmp.lt.s32.totalorder %s785_s12, 3 }
   0x4   : > { %p139_p2 = pnand %p627_p0, %p138_p1 }
   0x5   : > { %v755_v0 = vld [vmem:[%s942_s1] sm:$0xff] (!%p139_p2)   ;;  %s628_s16 = sshll.u32 (!%p139_p2), %s623_s13, 5  ;;  %v756_v1 = vld [vmem:[%s942_s1 + $0x8] sm:$0xff] (!%p139_p2)   ;;  %v757_v2 = vld [vmem:[%s942_s1 + $0x10] sm:$0xff] (!%p139_p2)  }
   0x6   : > { %142 = sbr.rel (%p139_p2) target bundleno = 280 (0x118), region = 32  ;;  %p163_p3 = scmp.lt.s32.totalorder (!%p139_p2), %s628_s16, 63  ;;  %683 = vmatprep.subr.bf16.mxu0 (!%p139_p2), %v755_v0  ;;  %731 = vmatprep.subr.bf16.mxu1 (!%p139_p2), %v755_v0  ;;  %v758_v3 = vld [vmem:[%s942_s1 + $0x18] sm:$0xff] (!%p139_p2)   ;;  %v759_v6 = vld [vmem:[%s942_s1 + $0x20] sm:$0xff] (!%p139_p2)   ;;  %v760_v7 = vld [vmem:[%s942_s1 + $0x28] sm:$0xff] (!%p139_p2)  }
   0x7   : > { %684 = vmatpush3.bf16.msra.mxu0 (!%p139_p2), %v755_v0  ;;  %739 = vmatpush3.bf16.msra.mxu1 (!%p139_p2), %v755_v0  ;;  %v761_v8 = vld [vmem:[%s942_s1 + $0x30] sm:$0xff] (!%p139_p2)   ;;  %v762_v9 = vld [vmem:[%s942_s1 + $0x38] sm:$0xff] (!%p139_p2)   ;;  %v867_v24 = vld [vmem:[%s943_s2] ss:$0 sm:$0xff] (!%p139_p2) }
   0x8   : > { %685 = vmatprep.subr.bf16.mxu0 (!%p139_p2), %v756_v1  ;;  %732 = vmatprep.subr.bf16.mxu1 (!%p139_p2), %v756_v1 }
   0xb   : > { %686 = vmatpush3.bf16.msra.mxu0 (!%p139_p2), %v756_v1  ;;  %740 = vmatpush3.bf16.msra.mxu1 (!%p139_p2), %v756_v1 }
   0xc   : > { %687 = vmatprep.subr.bf16.mxu0 (!%p139_p2), %v757_v2  ;;  %733 = vmatprep.subr.bf16.mxu1 (!%p139_p2), %v757_v2 }
   0xd   : > { %s946_s16 = smov (!%p163_p3, %s628_s16), 63 }
   0xe   : > { %s629_s21 = sshll.u32 %s946_s16, 2  ;;  %s631_s8 = sshll.u32 %s946_s16, 3 }
   0xf   : > { %s830_s24 = scalar_lea.vmem %s941_s0, %s629_s21  ;;  %688 = vmatpush3.bf16.msra.mxu0 %v757_v2  ;;  %741 = vmatpush3.bf16.msra.mxu1 %v757_v2  ;;  %s872_s14 = scalar_lea.vmem %s944_s3, %s631_s8 }
  0x10   : > { %v763_v4 = vld [vmem:[%s830_s24] sm:$0xff]   ;;  %689 = vmatprep.subr.bf16.mxu0 %v758_v3  ;;  %734 = vmatprep.subr.bf16.mxu1 %v758_v3  ;;  %v765_v10 = vld [vmem:[%s830_s24 + $0x8] sm:$0xff]   ;;  %v767_v12 = vld [vmem:[%s830_s24 + $0x10] sm:$0xff]  }
  0x11   : > { %v764_v5 = vld [vmem:[%s830_s24 + $0x40] sm:$0xff]   ;;  %699 = vmatprep.mubr.bf16.mxu0 %v763_v4  ;;  %v766_v11 = vld [vmem:[%s830_s24 + $0x48] sm:$0xff]   ;;  %v768_v13 = vld [vmem:[%s830_s24 + $0x50] sm:$0xff]  }
  0x12   : > { %715 = vmatprep.mubr.bf16.mxu1 %v764_v5  ;;  %v769_v14 = vld [vmem:[%s830_s24 + $0x18] sm:$0xff]   ;;  %v771_v16 = vld [vmem:[%s830_s24 + $0x20] sm:$0xff]   ;;  %v773_v18 = vld [vmem:[%s830_s24 + $0x28] sm:$0xff]  }
  0x13   : > { %690 = vmatpush3.bf16.msra.mxu0 %v758_v3  ;;  %742 = vmatpush3.bf16.msra.mxu1 %v758_v3  ;;  %v770_v15 = vld [vmem:[%s830_s24 + $0x58] sm:$0xff]   ;;  %v772_v17 = vld [vmem:[%s830_s24 + $0x60] sm:$0xff]   ;;  %v774_v19 = vld [vmem:[%s830_s24 + $0x68] sm:$0xff]  }
  0x14   : > { %691 = vmatprep.subr.bf16.mxu0 %v759_v6  ;;  %735 = vmatprep.subr.bf16.mxu1 %v759_v6  ;;  %v775_v20 = vld [vmem:[%s830_s24 + $0x30] sm:$0xff]   ;;  %v777_v22 = vld [vmem:[%s830_s24 + $0x38] sm:$0xff]  }
  0x15   : > { %v776_v21 = vld [vmem:[%s830_s24 + $0x70] sm:$0xff]   ;;  %v778_v23 = vld [vmem:[%s830_s24 + $0x78] sm:$0xff]  }
  0x17   : > { %692 = vmatpush3.bf16.msra.mxu0 %v759_v6  ;;  %743 = vmatpush3.bf16.msra.mxu1 %v759_v6 }
  0x18   : > { %693 = vmatprep.subr.bf16.mxu0 %v760_v7  ;;  %736 = vmatprep.subr.bf16.mxu1 %v760_v7 }
  0x1b   : > { %694 = vmatpush3.bf16.msra.mxu0 %v760_v7  ;;  %744 = vmatpush3.bf16.msra.mxu1 %v760_v7 }
  0x1c   : > { %695 = vmatprep.subr.bf16.mxu0 %v761_v8  ;;  %737 = vmatprep.subr.bf16.mxu1 %v761_v8 }
  0x1f   : > { %696 = vmatpush3.bf16.msra.mxu0 %v761_v8  ;;  %745 = vmatpush3.bf16.msra.mxu1 %v761_v8 }
  0x20   : > { %697 = vmatprep.subr.bf16.mxu0 %v762_v9  ;;  %738 = vmatprep.subr.bf16.mxu1 %v762_v9 }
  0x23   : > { %698 = vmatpush3.bf16.msra.mxu0 %v762_v9  ;;  %746 = vmatpush3.bf16.msra.mxu1 %v762_v9 }
  0x26   : > { %700 = vmatmul.mubr.bf16.vlgmr.msra.gmra.mrb[0].mxu0 %v765_v10  ;;  %716 = vmatmul.mubr.bf16.vlgmr.msra.gmra.mrb[0].mxu1 %v766_v11 }
  0x27   : > { %703 = vmatprep.mubr.bf16.mxu0 %v767_v12  ;;  %719 = vmatprep.mubr.bf16.mxu1 %v768_v13 }
  0x2e   : > { %704 = vmatmul.mubr.bf16.gmra.mrb[4].mxu0 %v769_v14  ;;  %720 = vmatmul.mubr.bf16.gmra.mrb[4].mxu1 %v770_v15 }
  0x2f   : > { %707 = vmatprep.mubr.bf16.mxu0 %v771_v16  ;;  %723 = vmatprep.mubr.bf16.mxu1 %v772_v17 }
  0x36   : > { %708 = vmatmul.mubr.bf16.gmra.mrb[8].mxu0 %v773_v18  ;;  %724 = vmatmul.mubr.bf16.gmra.mrb[8].mxu1 %v774_v19 }
  0x37   : > { %711 = vmatprep.mubr.bf16.mxu0 %v775_v20  ;;  %727 = vmatprep.mubr.bf16.mxu1 %v776_v21 }
  0x3e   : > { %712 = vmatmul.mubr.bf16.gmra.mrb[12].mxu0 %v777_v22  ;;  %728 = vmatmul.mubr.bf16.gmra.mrb[12].mxu1 %v778_v23 }
  0xf9   : > { %v701_v25 = vpop.f32.mrb[0].mxu0  ;;  %v717_v26 = vpop.f32.mrb[0].mxu1 }
  0xfa   : > { %v417_v27 = vadd.f32 %v701_v25, %v867_v24  ;;  %v481_v28 = vadd.f32 %v717_v26, %v867_v24  ;;  %v408_v29 = vpop.f32.mrb[1].mxu0  ;;  %v472_v30 = vpop.f32.mrb[1].mxu1 }
  0xfb   : > { %v409_v31 = vadd.f32 %v867_v24, %v408_v29  ;;  %v473_v32 = vadd.f32 %v867_v24, %v472_v30  ;;  %v702_v33 = vpop.f32.mrb[2].mxu0  ;;  %v718_v34 = vpop.f32.mrb[2].mxu1 }
  0xfc   : > { %537 = vst [vmem:[%s872_s14 + $0x10] sm:$0xff] %v417_v27  ;;  %553 = vst [vmem:[%s872_s14 + $0x90] sm:$0xff] %v481_v28  ;;  %v420_v35 = vadd.f32 %v702_v33, %v867_v24  ;;  %v484_v36 = vadd.f32 %v718_v34, %v867_v24  ;;  %v411_v37 = vpop.f32.mrb[3].mxu0  ;;  %v475_v38 = vpop.f32.mrb[3].mxu1 }
  0xfd   : > { %535 = vst [vmem:[%s872_s14] sm:$0xff] %v409_v31  ;;  %551 = vst [vmem:[%s872_s14 + $0x80] sm:$0xff] %v473_v32  ;;  %v412_v39 = vadd.f32 %v867_v24, %v411_v37  ;;  %v476_v40 = vadd.f32 %v867_v24, %v475_v38 }
  0xfe   : > { %538 = vst [vmem:[%s872_s14 + $0x18] sm:$0xff] %v420_v35  ;;  %554 = vst [vmem:[%s872_s14 + $0x98] sm:$0xff] %v484_v36 }
  0xff   : > { %536 = vst [vmem:[%s872_s14 + $0x8] sm:$0xff] %v412_v39  ;;  %552 = vst [vmem:[%s872_s14 + $0x88] sm:$0xff] %v476_v40 }
 0x101   : > { %v705_v41 = vpop.f32.mrb[4].mxu0  ;;  %v721_v42 = vpop.f32.mrb[4].mxu1 }
 0x102   : > { %v433_v43 = vadd.f32 %v705_v41, %v867_v24  ;;  %v497_v44 = vadd.f32 %v721_v42, %v867_v24  ;;  %v424_v45 = vpop.f32.mrb[5].mxu0  ;;  %v488_v46 = vpop.f32.mrb[5].mxu1 }
 0x103   : > { %v425_v47 = vadd.f32 %v867_v24, %v424_v45  ;;  %v489_v48 = vadd.f32 %v867_v24, %v488_v46  ;;  %v706_v49 = vpop.f32.mrb[6].mxu0  ;;  %v722_v50 = vpop.f32.mrb[6].mxu1 }
 0x104   : > { %541 = vst [vmem:[%s872_s14 + $0x30] sm:$0xff] %v433_v43  ;;  %557 = vst [vmem:[%s872_s14 + $0xb0] sm:$0xff] %v497_v44  ;;  %v436_v51 = vadd.f32 %v706_v49, %v867_v24  ;;  %v500_v52 = vadd.f32 %v722_v50, %v867_v24  ;;  %v427_v53 = vpop.f32.mrb[7].mxu0  ;;  %v491_v54 = vpop.f32.mrb[7].mxu1 }
 0x105   : > { %539 = vst [vmem:[%s872_s14 + $0x20] sm:$0xff] %v425_v47  ;;  %555 = vst [vmem:[%s872_s14 + $0xa0] sm:$0xff] %v489_v48  ;;  %v428_v55 = vadd.f32 %v867_v24, %v427_v53  ;;  %v492_v56 = vadd.f32 %v867_v24, %v491_v54 }
 0x106   : > { %542 = vst [vmem:[%s872_s14 + $0x38] sm:$0xff] %v436_v51  ;;  %558 = vst [vmem:[%s872_s14 + $0xb8] sm:$0xff] %v500_v52 }
 0x107   : > { %540 = vst [vmem:[%s872_s14 + $0x28] sm:$0xff] %v428_v55  ;;  %556 = vst [vmem:[%s872_s14 + $0xa8] sm:$0xff] %v492_v56 }
 0x109   : > { %v709_v57 = vpop.f32.mrb[8].mxu0  ;;  %v725_v58 = vpop.f32.mrb[8].mxu1 }
 0x10a   : > { %v449_v59 = vadd.f32 %v709_v57, %v867_v24  ;;  %v513_v60 = vadd.f32 %v725_v58, %v867_v24  ;;  %v440_v61 = vpop.f32.mrb[9].mxu0  ;;  %v504_v62 = vpop.f32.mrb[9].mxu1 }
 0x10b   : > { %v441_v63 = vadd.f32 %v867_v24, %v440_v61  ;;  %v505_v0 = vadd.f32 %v867_v24, %v504_v62  ;;  %v710_v1 = vpop.f32.mrb[10].mxu0  ;;  %v726_v2 = vpop.f32.mrb[10].mxu1 }
 0x10c   : > { %545 = vst [vmem:[%s872_s14 + $0x50] sm:$0xff] %v449_v59  ;;  %561 = vst [vmem:[%s872_s14 + $0xd0] sm:$0xff] %v513_v60  ;;  %v452_v3 = vadd.f32 %v710_v1, %v867_v24  ;;  %v516_v4 = vadd.f32 %v726_v2, %v867_v24  ;;  %v443_v5 = vpop.f32.mrb[11].mxu0  ;;  %v507_v6 = vpop.f32.mrb[11].mxu1 }
 0x10d   : > { %543 = vst [vmem:[%s872_s14 + $0x40] sm:$0xff] %v441_v63  ;;  %559 = vst [vmem:[%s872_s14 + $0xc0] sm:$0xff] %v505_v0  ;;  %v444_v7 = vadd.f32 %v867_v24, %v443_v5  ;;  %v508_v8 = vadd.f32 %v867_v24, %v507_v6 }
 0x10e   : > { %546 = vst [vmem:[%s872_s14 + $0x58] sm:$0xff] %v452_v3  ;;  %562 = vst [vmem:[%s872_s14 + $0xd8] sm:$0xff] %v516_v4 }
 0x10f   : > { %544 = vst [vmem:[%s872_s14 + $0x48] sm:$0xff] %v444_v7  ;;  %560 = vst [vmem:[%s872_s14 + $0xc8] sm:$0xff] %v508_v8 }
 0x111   : > { %v713_v9 = vpop.f32.mrb[12].mxu0  ;;  %v729_v10 = vpop.f32.mrb[12].mxu1 }
 0x112   : > { %v465_v11 = vadd.f32 %v713_v9, %v867_v24  ;;  %v529_v12 = vadd.f32 %v729_v10, %v867_v24  ;;  %v456_v13 = vpop.f32.mrb[13].mxu0  ;;  %v520_v14 = vpop.f32.mrb[13].mxu1 }
 0x113   : > { %v457_v15 = vadd.f32 %v867_v24, %v456_v13  ;;  %v521_v16 = vadd.f32 %v867_v24, %v520_v14  ;;  %v714_v17 = vpop.f32.mrb[14].mxu0  ;;  %v730_v18 = vpop.f32.mrb[14].mxu1 }
 0x114   : > { %549 = vst [vmem:[%s872_s14 + $0x70] sm:$0xff] %v465_v11  ;;  %565 = vst [vmem:[%s872_s14 + $0xf0] sm:$0xff] %v529_v12  ;;  %v468_v19 = vadd.f32 %v714_v17, %v867_v24  ;;  %v532_v20 = vadd.f32 %v730_v18, %v867_v24  ;;  %v459_v21 = vpop.f32.mrb[15].mxu0  ;;  %v523_v22 = vpop.f32.mrb[15].mxu1 }
 0x115   : > { %547 = vst [vmem:[%s872_s14 + $0x60] sm:$0xff] %v457_v15  ;;  %563 = vst [vmem:[%s872_s14 + $0xe0] sm:$0xff] %v521_v16  ;;  %v460_v23 = vadd.f32 %v867_v24, %v459_v21  ;;  %v524_v25 = vadd.f32 %v867_v24, %v523_v22 }
 0x116   : > { %550 = vst [vmem:[%s872_s14 + $0x78] sm:$0xff] %v468_v19  ;;  %566 = vst [vmem:[%s872_s14 + $0xf8] sm:$0xff] %v532_v20 }
 0x117   : > { %548 = vst [vmem:[%s872_s14 + $0x68] sm:$0xff] %v460_v23  ;;  %564 = vst [vmem:[%s872_s14 + $0xe8] sm:$0xff] %v524_v25 }
 0x118 PF: > { %s13_s12 = sadd.s32 1, %s785_s12  }
 0x119   : > { %p10_p4 = scmp.ge.s32.totalorder %s13_s12, 4  }
 0x11b   :  { %12 = sbr.rel (!%p10_p4) target bundleno = 1 (0x1), region = 62 }

// kernel: custom-call.2
= control target key start
LH: loop header
LB: loop body
LE: loop exit
PB: predicated region body
PF: predicated region fallthrough
CT: control target
= control target key end

     0   :  { %2 = vsyncpa [#allocation0], 0  ;;  %s61_s0 = inlined_call_operand.hbm [shape: c64[32,32,4,4], index: 0, kind: input, shape index: {}]   ;;  %s62_s1 = inlined_call_operand.vmem [shape: f32[32,32,4,4], index: 1, kind: output, shape index: {}]  }
   0x1   :  { %s3_s8 = sshll.u32 %s62_s1, 4  ;;  %s9_s11 = scalar_lea.hbm %s61_s0, 8192  ;;  %s4_s8 = int_to_ptr.vmem [resolvable:$true] %s3_s8 }
   0x2   :  { %p10_p0 = scmp.ne.s32.totalorder %s61_s0, %s9_s11  ;;  %s11_s16 = scalar_lea.hbm %s61_s0, 16384 }
   0x3   :  { %p12_p1 = scmp.lt.u32.totalorder %s11_s16, %s9_s11  ;;  %p13_p2 = scmp.lt.u32.totalorder %s9_s11, %s61_s0 }
   0x5   :  { %p14_p3 = por %p13_p2, %p12_p1 }
   0x7   :  { %p15_p4 = pnand %p14_p3, %p10_p0 }
   0x9   :  { %18 = shalt.err (!%p15_p4)  }
   0xa   :  { %s19_s1 = scalar_lea.vmem %s4_s8, 8192  ;;  %p24_p6 = scmp.lt.s32.totalorder %s4_s8, %s4_s8 }
   0xb   :  { %p20_p5 = scmp.ne.s32.totalorder %s4_s8, %s19_s1  ;;  %p25_p7 = scmp.lt.s32.totalorder %s19_s1, %s19_s1 }
   0xd   :  { %p26_p8 = por %p25_p7, %p24_p6 }
   0xf   :  { %p27_p9 = pnand %p26_p8, %p20_p5 }
  0x11   :  { %30 = shalt.err (!%p27_p9)  }
  0x12   :  { %6 = dma.hbm_to_vmem [thread:$0]  %s61_s0, 8192, %s4_s8, [#allocation0] }
  0x13   :  { %31 = dma.done.wait [#allocation0], 8192  }
  0x14   :  { %32 = vsyncadd [#allocation0], 4294959104 }
  0x15   :  { %8 = vsyncpa [#allocation0], 1 }

// kernel: custom-call.3
= control target key start
LH: loop header
LB: loop body
LE: loop exit
PB: predicated region body
PF: predicated region fallthrough
CT: control target
= control target key end

     0   :  { %s59_s0 = inlined_call_operand.hbm [shape: c64[32,32,4,4], index: 0, kind: input, shape index: {}]   ;;  %s60_s1 = inlined_call_operand.vmem [shape: f32[32,32,4,4], index: 1, kind: output, shape index: {}]  }
   0x1   :  { %s2_s8 = scalar_lea.hbm %s59_s0, 8192 }
   0x2   :  { %3 = vsyncpa [#allocation0], 0  ;;  %s4_s11 = sshll.u32 %s60_s1, 4  ;;  %s34_s14 = scalar_lea.hbm %s59_s0, 16384  ;;  %s5_s11 = int_to_ptr.vmem [resolvable:$true] %s4_s11 }
   0x3   :  { %p11_p0 = scmp.ne.s32.totalorder %s2_s8, %s34_s14  ;;  %p13_p1 = scmp.lt.u32.totalorder %s2_s8, %s59_s0 }
   0x4   :  { %p14_p2 = scmp.lt.u32.totalorder %s34_s14, %s34_s14  ;;  %p16_p4 = scmp.lt.u32.totalorder %s34_s14, %s2_s8 }
   0x6   :  { %p15_p3 = por %p14_p2, %p13_p1 }
   0x8   :  { %p17_p5 = por %p16_p4, %p15_p3 }
   0xa   :  { %p18_p6 = pnand %p17_p5, %p11_p0 }
   0xc   :  { %21 = shalt.err (!%p18_p6)  }
   0xd   :  { %s22_s17 = scalar_lea.vmem %s5_s11, 8192  ;;  %p27_p8 = scmp.lt.s32.totalorder %s5_s11, %s5_s11 }
   0xe   :  { %p23_p7 = scmp.ne.s32.totalorder %s5_s11, %s22_s17  ;;  %p28_p9 = scmp.lt.s32.totalorder %s22_s17, %s22_s17 }
  0x10   :  { %p29_p10 = por %p28_p9, %p27_p8 }
  0x12   :  { %p30_p11 = pnand %p29_p10, %p23_p7 }
  0x14   :  { %33 = shalt.err (!%p30_p11)  }
  0x15   :  { %7 = dma.hbm_to_vmem [thread:$0]  %s2_s8, 8192, %s5_s11, [#allocation0] }
  0x16   :  { %35 = dma.done.wait [#allocation0], 8192  }
  0x17   :  { %36 = vsyncadd [#allocation0], 4294959104 }
  0x18   :  { %9 = vsyncpa [#allocation0], 1 }

// kernel: reverse.4
= control target key start
LH: loop header
LB: loop body
LE: loop exit
PB: predicated region body
PF: predicated region fallthrough
CT: control target
= control target key end

     0   :  { %s344_s0 = inlined_call_operand.vmem [shape: f32[2,32,16,7], index: 0, kind: input, shape index: {}]   ;;  %s345_s1 = inlined_call_operand.vmem [shape: f32[2,32,16,7], index: 1, kind: output, shape index: {}]  }
   0x1   :  { %v112_v0 = vld [vmem:[%s344_s0 + $0x60] sm:$0xff]  ;;  %v113_v1 = vld [vmem:[%s344_s0 + $0xd0] sm:$0xff]  ;;  %v138_v14 = vld [vmem:[%s344_s0 + $0x68] sm:$0xff] }
   0x2   :  { %v115_v2 = vld [vmem:[%s344_s0 + $0x50] sm:$0xff]  ;;  %4 = vst [vmem:[%s345_s1] sm:$0xff] %v112_v0  ;;  %114 = vst [vmem:[%s345_s1 + $0x70] sm:$0xff] %v113_v1  ;;  %v117_v3 = vld [vmem:[%s344_s0 + $0xc0] sm:$0xff] }
   0x3   :  { %116 = vst [vmem:[%s345_s1 + $0x10] sm:$0xff] %v115_v2  ;;  %v119_v4 = vld [vmem:[%s344_s0 + $0x40] sm:$0xff]  ;;  %v121_v5 = vld [vmem:[%s344_s0 + $0xb0] sm:$0xff]  ;;  %118 = vst [vmem:[%s345_s1 + $0x80] sm:$0xff] %v117_v3 }
   0x4   :  { %120 = vst [vmem:[%s345_s1 + $0x20] sm:$0xff] %v119_v4  ;;  %122 = vst [vmem:[%s345_s1 + $0x90] sm:$0xff] %v121_v5  ;;  %v123_v6 = vld [vmem:[%s344_s0 + $0x30] sm:$0xff]  ;;  %v125_v7 = vld [vmem:[%s344_s0 + $0xa0] sm:$0xff] }
   0x5   :  { %v127_v8 = vld [vmem:[%s344_s0 + $0x20] sm:$0xff]  ;;  %124 = vst [vmem:[%s345_s1 + $0x30] sm:$0xff] %v123_v6  ;;  %126 = vst [vmem:[%s345_s1 + $0xa0] sm:$0xff] %v125_v7  ;;  %v129_v9 = vld [vmem:[%s344_s0 + $0x90] sm:$0xff] }
   0x6   :  { %128 = vst [vmem:[%s345_s1 + $0x40] sm:$0xff] %v127_v8  ;;  %v131_v10 = vld [vmem:[%s344_s0 + $0x10] sm:$0xff]  ;;  %v133_v11 = vld [vmem:[%s344_s0 + $0x80] sm:$0xff]  ;;  %130 = vst [vmem:[%s345_s1 + $0xb0] sm:$0xff] %v129_v9 }
   0x7   :  { %132 = vst [vmem:[%s345_s1 + $0x50] sm:$0xff] %v131_v10  ;;  %134 = vst [vmem:[%s345_s1 + $0xc0] sm:$0xff] %v133_v11  ;;  %v49_v12 = vld [vmem:[%s344_s0] sm:$0xff]  ;;  %v136_v13 = vld [vmem:[%s344_s0 + $0x70] sm:$0xff] }
   0x8   :  { %135 = vst [vmem:[%s345_s1 + $0x60] sm:$0xff] %v49_v12  ;;  %137 = vst [vmem:[%s345_s1 + $0xd0] sm:$0xff] %v136_v13  ;;  %v140_v15 = vld [vmem:[%s344_s0 + $0xd8] sm:$0xff]  ;;  %v144_v17 = vld [vmem:[%s344_s0 + $0xc8] sm:$0xff] }
   0x9   :  { %139 = vst [vmem:[%s345_s1 + $0x8] sm:$0xff] %v138_v14  ;;  %v142_v16 = vld [vmem:[%s344_s0 + $0x58] sm:$0xff]  ;;  %141 = vst [vmem:[%s345_s1 + $0x78] sm:$0xff] %v140_v15  ;;  %v146_v18 = vld [vmem:[%s344_s0 + $0x48] sm:$0xff] }
   0xa   :  { %143 = vst [vmem:[%s345_s1 + $0x18] sm:$0xff] %v142_v16  ;;  %145 = vst [vmem:[%s345_s1 + $0x88] sm:$0xff] %v144_v17  ;;  %v148_v19 = vld [vmem:[%s344_s0 + $0xb8] sm:$0xff]  ;;  %v152_v21 = vld [vmem:[%s344_s0 + $0xa8] sm:$0xff] }
   0xb   :  { %v150_v20 = vld [vmem:[%s344_s0 + $0x38] sm:$0xff]  ;;  %147 = vst [vmem:[%s345_s1 + $0x28] sm:$0xff] %v146_v18  ;;  %149 = vst [vmem:[%s345_s1 + $0x98] sm:$0xff] %v148_v19  ;;  %v154_v22 = vld [vmem:[%s344_s0 + $0x28] sm:$0xff] }
   0xc   :  { %151 = vst [vmem:[%s345_s1 + $0x38] sm:$0xff] %v150_v20  ;;  %v156_v23 = vld [vmem:[%s344_s0 + $0x98] sm:$0xff]  ;;  %153 = vst [vmem:[%s345_s1 + $0xa8] sm:$0xff] %v152_v21  ;;  %v160_v25 = vld [vmem:[%s344_s0 + $0x88] sm:$0xff] }
   0xd   :  { %155 = vst [vmem:[%s345_s1 + $0x48] sm:$0xff] %v154_v22  ;;  %157 = vst [vmem:[%s345_s1 + $0xb8] sm:$0xff] %v156_v23  ;;  %v158_v24 = vld [vmem:[%s344_s0 + $0x18] sm:$0xff]  ;;  %v162_v26 = vld [vmem:[%s344_s0 + $0x8] sm:$0xff] }
   0xe   :  { %159 = vst [vmem:[%s345_s1 + $0x58] sm:$0xff] %v158_v24  ;;  %161 = vst [vmem:[%s345_s1 + $0xc8] sm:$0xff] %v160_v25  ;;  %v164_v27 = vld [vmem:[%s344_s0 + $0x78] sm:$0xff] }
   0xf   :  { %163 = vst [vmem:[%s345_s1 + $0x68] sm:$0xff] %v162_v26  ;;  %165 = vst [vmem:[%s345_s1 + $0xd8] sm:$0xff] %v164_v27 }

</bundles_post_ra>
